<compile_context>
chip_gen: v5e
topology: v5e:2x2
jax: 0.10.0
libtpu: 0.0.40
codegen_flags: <defaults>
</compile_context>

<pallas_src>
import jax
import jax.numpy as jnp
from jax.experimental import pallas as pl
from jax.experimental.pallas import tpu as pltpu

_SUBLANE = 8           # sublane width (second-to-last-dim tiling unit)
_TILE_M = 2048         # row tile: large enough to amortize per-step overhead
_MIN_ROWS_FOR_PALLAS = 8192   # below this, XLA fused dots beat a Pallas launch


def _round_up(x: int, m: int) -> int:
    return (x + m - 1) // m * m


def _fc_kernel(x_ref, w1_ref, b1_ref, w2_ref, b2_ref, o_ref):
    # Cast x to the compute dtype in-VMEM (no padded bf16 copy of x in HBM).
    x = x_ref[...].astype(w1_ref.dtype)
    # Layer 1: Linear + tanh.  f32 accumulation and f32 bias/tanh epilogue even
    # when operands are bf16 (v5e has no bf16 VPU/EUP path; f32 keeps accuracy).
    h = jnp.dot(x, w1_ref[...], preferred_element_type=jnp.float32)
    h = jnp.tanh(h + b1_ref[...])
    # TODO(synk): dropout between layers is identity in eval mode (training-only).
    # Layer 2 (FC output layer): Linear, no output_activation.
    o = jnp.dot(h.astype(w2_ref.dtype), w2_ref[...],
                preferred_element_type=jnp.float32)
    o_ref[...] = (o + b2_ref[...]).astype(o_ref.dtype)


def input_output_net_forward(x, w1, b1, w2, b2, *,
                             compute_dtype=jnp.bfloat16,
                             tile_m: int = _TILE_M,
                             force_pallas: bool = False):
    """Apply the (single) FC network of InputOutputNet.

    x  : [B, T, input_size]  float32
    w1 : [input_size, h1]    (transposed PyTorch Linear weight)
    b1 : [1, h1]
    w2 : [h1, h2]
    b2 : [1, h2]
    compute_dtype : dtype of the matmul operands (bf16 for MXU throughput; f32
                    for exactness). Accumulation, bias add and tanh are f32.
    returns [B, T, h2]  float32
    """
    B, T, F = x.shape
    H1 = w1.shape[1]
    H2 = w2.shape[1]
    M = B * T
    x2d = x.reshape(M, F)
    cd = compute_dtype

    # Size-gated fallback: for small inputs a plain XLA dot fusion wins over
    # the per-grid-step + DMA setup overhead of a Pallas launch.
    if M < _MIN_ROWS_FOR_PALLAS and not force_pallas:
        h = jnp.tanh(jnp.dot(x2d.astype(cd), w1.astype(cd),
                             preferred_element_type=jnp.float32)
                     + b1.astype(jnp.float32))
        out2d = (jnp.dot(h.astype(cd), w2.astype(cd),
                         preferred_element_type=jnp.float32)
                 + b2.astype(jnp.float32))
        return out2d.reshape(B, T, H2)

    # Row tiling only; feature dims stay at their true widths (full-dim blocks
    # are legal even when < 128 lanes).  Keep >= 2 grid steps where the row
    # count allows it so the "parallel" axis feeds both TensorCores on v7x.
    M8 = _round_up(M, _SUBLANE)
    half = _round_up((M8 + 1) // 2, _SUBLANE)
    tile_m = min(tile_m, M8 if M8 < 2 * _SUBLANE else half)
    M_p = _round_up(M, tile_m)
    if M_p != M:
        # Zero-pad rows only (cheap); padded output rows are sliced off below.
        x2d = jnp.pad(x2d, ((0, M_p - M), (0, 0)))

    # Weights/biases at true shapes; only a (tiny) dtype cast for the bf16 path.
    # TODO(synk): hoist this cast out of the per-call path by storing params in
    # compute_dtype at model-load time.
    w1_c = w1.astype(cd)
    w2_c = w2.astype(cd)
    b1_c = b1.astype(jnp.float32)
    b2_c = b2.astype(jnp.float32)

    grid = (M_p // tile_m,)

    cost = pl.CostEstimate(
        flops=2 * M_p * (F * H1 + H1 * H2),
        transcendentals=M_p * H1,
        bytes_accessed=(M_p * F * x2d.dtype.itemsize          # read x
                        + M_p * H2 * 4                        # write out (f32)
                        + F * H1 * w1_c.dtype.itemsize
                        + H1 * H2 * w2_c.dtype.itemsize
                        + (H1 + H2) * 4),
    )

    out2d = pl.pallas_call(
        _fc_kernel,
        out_shape=jax.ShapeDtypeStruct((M_p, H2), jnp.float32),
        grid=grid,
        in_specs=[
            pl.BlockSpec((tile_m, F), lambda i: (i, 0)),   # x: tiled over rows
            pl.BlockSpec((F, H1), lambda i: (0, 0)),       # w1: VMEM-resident
            pl.BlockSpec((1, H1), lambda i: (0, 0)),       # b1: VMEM-resident
            pl.BlockSpec((H1, H2), lambda i: (0, 0)),      # w2: VMEM-resident
            pl.BlockSpec((1, H2), lambda i: (0, 0)),       # b2: VMEM-resident
        ],
        out_specs=pl.BlockSpec((tile_m, H2), lambda i: (i, 0)),
        compiler_params=pltpu.CompilerParams(
            # Row tiles are independent -> megacore sharding on v7x.
            dimension_semantics=("parallel",),
        ),
        cost_estimate=cost,
    )(x2d, w1_c, b1_c, w2_c, b2_c)

    # Drop padded rows (they contain tanh(b1)@w2 + b2, not zeros).
    return out2d[:M, :].reshape(B, T, H2)


def _init_linear_params(key, fan_in, fan_out):
    """Deterministic init mimicking PyTorch nn.Linear default:
    U(-1/sqrt(fan_in), 1/sqrt(fan_in)) for both weight and bias."""
    kw, kb = jax.random.split(key)
    bound = 1.0 / jnp.sqrt(jnp.float32(fan_in))
    # Stored already transposed: [fan_in, fan_out]
    w = jax.random.uniform(kw, (fan_in, fan_out), jnp.float32, -bound, bound)
    b = jax.random.uniform(kb, (1, fan_out), jnp.float32, -bound, bound)
    return w, b


def _reference(x, w1, b1, w2, b2):
    B, T, F = x.shape
    H2 = w2.shape[1]
    h = jnp.tanh(x.reshape(B * T, F) @ w1 + b1)
    return (h @ w2 + b2).reshape(B, T, H2)


if __name__ == "__main__":
    # Time-series input [B, T, input_size]; B*T = 1024 rows -> two 512-row
    # grid steps through the Pallas kernel (>= 2 steps keeps both v7x TCs busy).
    B, T, INPUT_SIZE = 2, 512, 16
    HIDDENS = [32, 32]   # network_spec['hiddens']; FC output_size = HIDDENS[-1]

    key = jax.random.PRNGKey(0)
    kx, k1, k2 = jax.random.split(key, 3)

    x = jax.random.normal(kx, (B, T, INPUT_SIZE), jnp.float32)
    w1, b1 = _init_linear_params(k1, INPUT_SIZE, HIDDENS[0])
    w2, b2 = _init_linear_params(k2, HIDDENS[0], HIDDENS[1])

    # Plain-JAX reference (same math as the PyTorch FC net in eval mode).
    ref = _reference(x, w1, b1, w2, b2)

    # 1) f32-operand Pallas path: must match the reference tightly.
    out_f32 = input_output_net_forward(x, w1, b1, w2, b2,
                                       compute_dtype=jnp.float32,
                                       force_pallas=True)
    out_f32 = jax.block_until_ready(out_f32)
    assert out_f32.shape == (B, T, HIDDENS[1])
    assert jnp.allclose(out_f32, ref, atol=1e-5, rtol=1e-5)

    # 2) bf16-operand / f32-accumulate path (MXU-friendly on v5e/v6e/v7x).
    out_bf16 = input_output_net_forward(x, w1, b1, w2, b2,
                                        compute_dtype=jnp.bfloat16,
                                        force_pallas=True)
    out_bf16 = jax.block_until_ready(out_bf16)
    assert out_bf16.shape == (B, T, HIDDENS[1])
    assert jnp.allclose(out_bf16, ref, atol=5e-2, rtol=5e-2)

    # 3) Ragged row count exercises the row-padding path (M not a multiple of
    #    the tile; padded garbage rows must be sliced off correctly).
    x_ragged = jax.random.normal(kx, (2, 300, INPUT_SIZE), jnp.float32)
    out_ragged = jax.block_until_ready(
        input_output_net_forward(x_ragged, w1, b1, w2, b2,
                                 compute_dtype=jnp.float32,
                                 force_pallas=True))
    assert jnp.allclose(out_ragged, _reference(x_ragged, w1, b1, w2, b2),
                        atol=1e-5, rtol=1e-5)

    # 4) Tiny input exercises the size-gated plain-XLA fallback.
    x_small = jax.random.normal(kx, (2, 8, INPUT_SIZE), jnp.float32)
    out_small = jax.block_until_ready(
        input_output_net_forward(x_small, w1, b1, w2, b2,
                                 compute_dtype=jnp.float32))
    assert jnp.allclose(out_small, _reference(x_small, w1, b1, w2, b2),
                        atol=1e-5, rtol=1e-5)

    print("KERNEL_OK")
</pallas_src>

<mosaic_0001>
module attributes {stable_mosaic.version = 11 : i64} {
  func.func @_fc_kernel(%arg0: i32, %arg1: memref<512x16xf32, #tpu.memory_space<vmem>>, %arg2: memref<16x32xf32, #tpu.memory_space<vmem>>, %arg3: memref<1x32xf32, #tpu.memory_space<vmem>>, %arg4: memref<32x32xf32, #tpu.memory_space<vmem>>, %arg5: memref<1x32xf32, #tpu.memory_space<vmem>>, %arg6: memref<512x32xf32, #tpu.memory_space<vmem>>) attributes {dimension_semantics = [#tpu.dimension_semantics<parallel>], iteration_bounds = array<i64: 2>, scalar_prefetch = 0 : i64, scratch_operands = 0 : i64, tpu.core_type = #tpu.core_type<tc>, window_params = [{transform_indices = @transform_0, window_bounds = array<i64: 512, 16>}, {pipeline_mode = #tpu.pipeline_mode<synchronous>, transform_indices = @transform_1, window_bounds = array<i64: 16, 32>}, {pipeline_mode = #tpu.pipeline_mode<synchronous>, transform_indices = @transform_2, window_bounds = array<i64: 1, 32>}, {pipeline_mode = #tpu.pipeline_mode<synchronous>, transform_indices = @transform_3, window_bounds = array<i64: 32, 32>}, {pipeline_mode = #tpu.pipeline_mode<synchronous>, transform_indices = @transform_4, window_bounds = array<i64: 1, 32>}, {transform_indices = @transform_5, window_bounds = array<i64: 512, 32>}]} {
    %c0 = arith.constant 0 : index
    %c0_0 = arith.constant 0 : index
    %0 = vector.load %arg1[%c0, %c0_0] : memref<512x16xf32, #tpu.memory_space<vmem>>, vector<512x16xf32>
    %c0_1 = arith.constant 0 : index
    %c0_2 = arith.constant 0 : index
    %1 = vector.load %arg2[%c0_1, %c0_2] : memref<16x32xf32, #tpu.memory_space<vmem>>, vector<16x32xf32>
    %cst = arith.constant dense<0.000000e+00> : vector<512x32xf32>
    %2 = tpu.matmul %0, %1, %cst {dimension_numbers = #tpu.dot_dimension_numbers<[1], [0], [0], [1], [0, 0, 1, 1], [], []>} : vector<512x16xf32>, vector<16x32xf32>, vector<512x32xf32> -> vector<512x32xf32>
    %c0_3 = arith.constant 0 : index
    %c0_4 = arith.constant 0 : index
    %3 = vector.load %arg3[%c0_3, %c0_4] : memref<1x32xf32, #tpu.memory_space<vmem>>, vector<1x32xf32>
    %4 = vector.broadcast %3 : vector<1x32xf32> to vector<512x32xf32>
    %5 = arith.addf %2, %4 : vector<512x32xf32>
    %6 = math.tanh %5 : vector<512x32xf32>
    %c0_5 = arith.constant 0 : index
    %c0_6 = arith.constant 0 : index
    %7 = vector.load %arg4[%c0_5, %c0_6] : memref<32x32xf32, #tpu.memory_space<vmem>>, vector<32x32xf32>
    %cst_7 = arith.constant dense<0.000000e+00> : vector<512x32xf32>
    %8 = tpu.matmul %6, %7, %cst_7 {dimension_numbers = #tpu.dot_dimension_numbers<[1], [0], [0], [1], [0, 0, 1, 1], [], []>} : vector<512x32xf32>, vector<32x32xf32>, vector<512x32xf32> -> vector<512x32xf32>
    %c0_8 = arith.constant 0 : index
    %c0_9 = arith.constant 0 : index
    %9 = vector.load %arg5[%c0_8, %c0_9] : memref<1x32xf32, #tpu.memory_space<vmem>>, vector<1x32xf32>
    %10 = vector.broadcast %9 : vector<1x32xf32> to vector<512x32xf32>
    %11 = arith.addf %8, %10 : vector<512x32xf32>
    %c0_10 = arith.constant 0 : index
    %c0_11 = arith.constant 0 : index
    %12 = vector.load %arg6[%c0_10, %c0_11] : memref<512x32xf32, #tpu.memory_space<vmem>>, vector<512x32xf32>
    tpu.vector_store %arg6[%c0_10, %c0_11], %11 {strides = array<i32>} : memref<512x32xf32, #tpu.memory_space<vmem>>, vector<512x32xf32>,
    return
  }
  func.func @transform_0(%arg0: i32) -> (i32, i32) {
    %c0_i32 = arith.constant 0 : i32
    %c0_i32_0 = arith.constant 0 : i32
    return %arg0, %c0_i32 : i32, i32
  }
  func.func @transform_1(%arg0: i32) -> (i32, i32) {
    %c0_i32 = arith.constant 0 : i32
    %c0_i32_0 = arith.constant 0 : i32
    %c0_i32_1 = arith.constant 0 : i32
    return %c0_i32, %c0_i32_0 : i32, i32
  }
  func.func @transform_2(%arg0: i32) -> (i32, i32) {
    %c0_i32 = arith.constant 0 : i32
    %c0_i32_0 = arith.constant 0 : i32
    %c0_i32_1 = arith.constant 0 : i32
    return %c0_i32, %c0_i32_0 : i32, i32
  }
  func.func @transform_3(%arg0: i32) -> (i32, i32) {
    %c0_i32 = arith.constant 0 : i32
    %c0_i32_0 = arith.constant 0 : i32
    %c0_i32_1 = arith.constant 0 : i32
    return %c0_i32, %c0_i32_0 : i32, i32
  }
  func.func @transform_4(%arg0: i32) -> (i32, i32) {
    %c0_i32 = arith.constant 0 : i32
    %c0_i32_0 = arith.constant 0 : i32
    %c0_i32_1 = arith.constant 0 : i32
    return %c0_i32, %c0_i32_0 : i32, i32
  }
  func.func @transform_5(%arg0: i32) -> (i32, i32) {
    %c0_i32 = arith.constant 0 : i32
    %c0_i32_0 = arith.constant 0 : i32
    return %arg0, %c0_i32 : i32, i32
  }
}

</mosaic_0001>

<bundles_post_ra>
// kernel: tpu_custom_call.1
= control target key start
LH: loop header
LB: loop body
LE: loop exit
PB: predicated region body
PF: predicated region fallthrough
CT: control target
= control target key end

     0   :  { %s1616_s18 = smov 0   ;;  %s2118_s0 = inlined_call_operand.vmem [shape: f32[1024,16], index: 0, kind: input, shape index: {}]   ;;  %s2119_s1 = inlined_call_operand.vmem [shape: f32[16,32], index: 1, kind: input, shape index: {}]   ;;  %s2120_s2 = inlined_call_operand.vmem [shape: f32[1,32], index: 2, kind: input, shape index: {}]   ;;  %s2121_s3 = inlined_call_operand.vmem [shape: f32[32,32], index: 3, kind: input, shape index: {}]   ;;  %s2122_s4 = inlined_call_operand.vmem [shape: f32[1,32], index: 4, kind: input, shape index: {}]   ;;  %s2123_s5 = inlined_call_operand.vmem [shape: f32[1024,32], index: 5, kind: output, shape index: {}]  }
   0x1 LB: > { %s1294_s19 = sadd.s32 4294967295, %s1584_s18   ;;  %p1298_p0 = scmp.ge.s32.totalorder %s1584_s18, 1  ;;  %s1584_s18 = sphi %s1616_s18, %s15_s18  }
   0x2   : > { %p188_p1 = scmp.lt.s32.totalorder %s1584_s18, 3 }
   0x4   : > { %p189_p2 = pnand %p1298_p0, %p188_p1 }
   0x5   : > { %s1299_s24 = sshll.u32 (!%p189_p2), %s1294_s19, 6 }
   0x6   : > { %192 = sbr.rel (%p189_p2) target bundleno = 789 (0x315), region = 40  ;;  %p217_p3 = scmp.lt.s32.totalorder (!%p189_p2), %s1299_s24, 127 }
   0xb   : > { %v293_v0 = vld [vmem:[%s2119_s1 + $0x8] sm:$0xff]  ;;  %v292_v1 = vld [vmem:[%s2119_s1] sm:$0xff]  ;;  %s2125_s24 = smov (!%p217_p3, %s1299_s24), 127  ;;  %vm298_vm0 = vcmask 130048   ;;  %v767_v15 = vld [vmem:[%s2121_s3 + $0x18] sm:$0xff]  ;;  %vm772_vm1 = vcmask 261120  }
   0xc   : > { %505 = vmatpush.msra.mxu0 %v293_v0  ;;  %1433 = vmatpush.msra.mxu3 %v293_v0  ;;  %s1300_s25 = sshll.u32 %s2125_s24, 3  ;;  %v766_v16 = vld [vmem:[%s2121_s3 + $0x10] sm:$0xff]  ;;  %v765_v17 = vld [vmem:[%s2121_s3 + $0x8] sm:$0xff]  ;;  %v764_v19 = vld [vmem:[%s2121_s3] sm:$0xff] }
   0xd   : > { %s1638_s28 = scalar_lea.vmem %s2118_s0, %s1300_s25  ;;  %977 = vmatpush.msra.mxu1 %v767_v15  ;;  %1435 = vmatpush.msra.mxu2 %v767_v15  ;;  %v1687_v22 = vld [vmem:[%s2120_s2] ss:$0 sm:$0xff]  ;;  %s1776_s19 = scalar_lea.vmem %s2123_s5, %s1300_s25 }
   0xe   : > { %506 = vmatpush.msra.mxu0 %v292_v1  ;;  %1434 = vmatpush.msra.mxu3 %v292_v1  ;;  %v228_v2 = vld [vmem:[%s1638_s28] sm:$0xff]  ;;  %v229_v3 = vld [vmem:[%s1638_s28 + $0x8] sm:$0xff]  ;;  %v230_v4 = vld [vmem:[%s1638_s28 + $0x10] sm:$0xff] }
   0xf   : > { %1303 = vmatmul.msk.f32.vlgmr.msra.gmra.mxu0 %vm298_vm0, %v228_v2  ;;  %v231_v5 = vld [vmem:[%s1638_s28 + $0x18] sm:$0xff]  ;;  %v232_v6 = vld [vmem:[%s1638_s28 + $0x20] sm:$0xff]  ;;  %v233_v7 = vld [vmem:[%s1638_s28 + $0x28] sm:$0xff]  ;;  %978 = vmatpush.msra.mxu1 %v766_v16 }
  0x10   : > { %v234_v8 = vld [vmem:[%s1638_s28 + $0x30] sm:$0xff]  ;;  %v235_v9 = vld [vmem:[%s1638_s28 + $0x38] sm:$0xff]  ;;  %v236_v10 = vld [vmem:[%s1638_s28 + $0x40] sm:$0xff]  ;;  %1436 = vmatpush.msra.mxu2 %v766_v16 }
  0x11   : > { %v237_v11 = vld [vmem:[%s1638_s28 + $0x48] sm:$0xff]  ;;  %v238_v12 = vld [vmem:[%s1638_s28 + $0x50] sm:$0xff]  ;;  %v239_v13 = vld [vmem:[%s1638_s28 + $0x58] sm:$0xff]  ;;  %979 = vmatpush.msra.mxu1 %v765_v17 }
  0x12   : > { %v240_v14 = vld [vmem:[%s1638_s28 + $0x60] sm:$0xff]  ;;  %v241_v18 = vld [vmem:[%s1638_s28 + $0x68] sm:$0xff]  ;;  %1437 = vmatpush.msra.mxu2 %v765_v17  ;;  %v242_v20 = vld [vmem:[%s1638_s28 + $0x70] sm:$0xff] }
  0x13   : > { %980 = vmatpush.msra.mxu1 %v764_v19  ;;  %v243_v21 = vld [vmem:[%s1638_s28 + $0x78] sm:$0xff]  ;;  %v244_v24 = vld [vmem:[%s1638_s28 + $0x80] sm:$0xff]  ;;  %v245_v27 = vld [vmem:[%s1638_s28 + $0x88] sm:$0xff] }
  0x14   : > { %1438 = vmatpush.msra.mxu2 %v764_v19  ;;  %v246_v31 = vld [vmem:[%s1638_s28 + $0x90] sm:$0xff]  ;;  %v247_v35 = vld [vmem:[%s1638_s28 + $0x98] sm:$0xff]  ;;  %v248_v39 = vld [vmem:[%s1638_s28 + $0xa0] sm:$0xff] }
  0x15   : > { %v249_v43 = vld [vmem:[%s1638_s28 + $0xa8] sm:$0xff]  ;;  %v250_v47 = vld [vmem:[%s1638_s28 + $0xb0] sm:$0xff]  ;;  %v251_v51 = vld [vmem:[%s1638_s28 + $0xb8] sm:$0xff] }
  0x16   : > { %v252_v55 = vld [vmem:[%s1638_s28 + $0xc0] sm:$0xff]  ;;  %v253_v59 = vld [vmem:[%s1638_s28 + $0xc8] sm:$0xff]  ;;  %v254_v63 = vld [vmem:[%s1638_s28 + $0xd0] sm:$0xff] }
  0x17   : > { %1304 = vmatmul.msk.f32.gmra.mxu0 %vm298_vm0, %v229_v3  ;;  %v255_v3 = vld [vmem:[%s1638_s28 + $0xd8] sm:$0xff]  ;;  %v262_v15 = vld [vmem:[%s1638_s28 + $0x110] sm:$0xff] }
  0x18   : > { %v258_v17 = vld [vmem:[%s1638_s28 + $0xf0] sm:$0xff] }
  0x1f   : > { %1305 = vmatmul.msk.f32.gmra.mxu0 %vm298_vm0, %v230_v4 }
  0x27   : > { %1306 = vmatmul.msk.f32.gmra.mxu0 %vm298_vm0, %v231_v5 }
  0x2f   : > { %1307 = vmatmul.msk.f32.gmra.mxu0 %vm298_vm0, %v232_v6 }
  0x37   : > { %1308 = vmatmul.msk.f32.gmra.mxu0 %vm298_vm0, %v233_v7  ;;  %v256_v7 = vld [vmem:[%s1638_s28 + $0xe0] sm:$0xff] }
  0x3f   : > { %1309 = vmatmul.msk.f32.gmra.mxu0 %vm298_vm0, %v234_v8 }
  0x47   : > { %1310 = vmatmul.msk.f32.gmra.mxu0 %vm298_vm0, %v235_v9 }
  0x4f   : > { %1311 = vmatmul.msk.f32.gmra.mxu0 %vm298_vm0, %v236_v10  ;;  %v261_v10 = vld [vmem:[%s1638_s28 + $0x108] sm:$0xff] }
  0x50   : > { %1336 = vmatmul.msk.f32.vlgmr.msra.gmra.mxu3 %vm298_vm0, %v261_v10  ;;  %v272_v10 = vld [vmem:[%s1638_s28 + $0x160] sm:$0xff] }
  0x57   : > { %1312 = vmatmul.msk.f32.gmra.mxu0 %vm298_vm0, %v237_v11 }
  0x58   : > { %1337 = vmatmul.msk.f32.gmra.mxu3 %vm298_vm0, %v262_v15 }
  0x5f   : > { %1313 = vmatmul.msk.f32.gmra.mxu0 %vm298_vm0, %v238_v12  ;;  %v257_v12 = vld [vmem:[%s1638_s28 + $0xe8] sm:$0xff] }
  0x67   : > { %1314 = vmatmul.msk.f32.gmra.mxu0 %vm298_vm0, %v239_v13 }
  0x6f   : > { %1315 = vmatmul.msk.f32.gmra.mxu0 %vm298_vm0, %v240_v14 }
  0x77   : > { %1316 = vmatmul.msk.f32.gmra.mxu0 %vm298_vm0, %v241_v18 }
  0x7f   : > { %1317 = vmatmul.msk.f32.gmra.mxu0 %vm298_vm0, %v242_v20  ;;  %v263_v20 = vld [vmem:[%s1638_s28 + $0x118] sm:$0xff] }
  0x80   : > { %1338 = vmatmul.msk.f32.gmra.mxu3 %vm298_vm0, %v263_v20 }
  0x87   : > { %1318 = vmatmul.msk.f32.gmra.mxu0 %vm298_vm0, %v243_v21 }
  0x8c   : > { %v508_v23 = vpop.f32.mrf.mxu0 }
  0x8d   : > { %v509_v25 = vadd.f32 %v1687_v22, %v508_v23  ;;  %v259_v23 = vld [vmem:[%s1638_s28 + $0xf8] sm:$0xff] }
  0x8f   : > { %1449 = vtanh.f32 %v509_v25  ;;  %1319 = vmatmul.msk.f32.gmra.mxu0 %vm298_vm0, %v244_v24 }
  0x94   : > { %v511_v26 = vpop.f32.mrf.mxu0 }
  0x95   : > { %v1450_v28 = vpop.eup %1449  ;;  %v512_v29 = vadd.f32 %v1687_v22, %v511_v26  ;;  %v264_v26 = vld [vmem:[%s1638_s28 + $0x120] sm:$0xff] }
  0x96   : > { %1367 = vmatmul.msk.f32.vlgmr.msra.gmra.mxu1 %vm772_vm1, %v1450_v28  ;;  %1339 = vmatmul.msk.f32.gmra.mxu3 %vm298_vm0, %v264_v26  ;;  %v260_v28 = vld [vmem:[%s1638_s28 + $0x100] sm:$0xff] }
  0x97   : > { %1451 = vtanh.f32 %v512_v29  ;;  %1320 = vmatmul.msk.f32.gmra.mxu0 %vm298_vm0, %v245_v27 }
  0x9c   : > { %v514_v30 = vpop.f32.mrf.mxu0 }
  0x9d   : > { %v1452_v32 = vpop.eup %1451  ;;  %v515_v33 = vadd.f32 %v1687_v22, %v514_v30 }
  0x9e   : > { %1368 = vmatmul.msk.f32.gmra.mxu1 %vm772_vm1, %v1452_v32  ;;  %v1768_v32 = vld [vmem:[%s2122_s4] ss:$0 sm:$0xff] }
  0x9f   : > { %1453 = vtanh.f32 %v515_v33  ;;  %1321 = vmatmul.msk.f32.gmra.mxu0 %vm298_vm0, %v246_v31  ;;  %v265_v31 = vld [vmem:[%s1638_s28 + $0x128] sm:$0xff] }
  0xa0   : > { %1340 = vmatmul.msk.f32.gmra.mxu3 %vm298_vm0, %v265_v31 }
  0xa4   : > { %v517_v34 = vpop.f32.mrf.mxu0 }
  0xa5   : > { %v1454_v36 = vpop.eup %1453  ;;  %v518_v37 = vadd.f32 %v1687_v22, %v517_v34 }
  0xa6   : > { %1369 = vmatmul.msk.f32.gmra.mxu1 %vm772_vm1, %v1454_v36 }
  0xa7   : > { %1455 = vtanh.f32 %v518_v37  ;;  %1322 = vmatmul.msk.f32.gmra.mxu0 %vm298_vm0, %v247_v35 }
  0xac   : > { %v520_v38 = vpop.f32.mrf.mxu0 }
  0xad   : > { %v1456_v40 = vpop.eup %1455  ;;  %v521_v41 = vadd.f32 %v1687_v22, %v520_v38  ;;  %v266_v38 = vld [vmem:[%s1638_s28 + $0x130] sm:$0xff] }
  0xae   : > { %1370 = vmatmul.msk.f32.gmra.mxu1 %vm772_vm1, %v1456_v40  ;;  %1341 = vmatmul.msk.f32.gmra.mxu3 %vm298_vm0, %v266_v38 }
  0xaf   : > { %1457 = vtanh.f32 %v521_v41  ;;  %1323 = vmatmul.msk.f32.gmra.mxu0 %vm298_vm0, %v248_v39 }
  0xb4   : > { %v523_v42 = vpop.f32.mrf.mxu0 }
  0xb5   : > { %v1458_v44 = vpop.eup %1457  ;;  %v524_v45 = vadd.f32 %v1687_v22, %v523_v42 }
  0xb6   : > { %1371 = vmatmul.msk.f32.gmra.mxu1 %vm772_vm1, %v1458_v44  ;;  %v267_v44 = vld [vmem:[%s1638_s28 + $0x138] sm:$0xff] }
  0xb7   : > { %1459 = vtanh.f32 %v524_v45  ;;  %1324 = vmatmul.msk.f32.gmra.mxu0 %vm298_vm0, %v249_v43  ;;  %1342 = vmatmul.msk.f32.gmra.mxu3 %vm298_vm0, %v267_v44 }
  0xbc   : > { %v526_v46 = vpop.f32.mrf.mxu0 }
  0xbd   : > { %v1460_v48 = vpop.eup %1459  ;;  %v527_v49 = vadd.f32 %v1687_v22, %v526_v46 }
  0xbe   : > { %1372 = vmatmul.msk.f32.gmra.mxu1 %vm772_vm1, %v1460_v48 }
  0xbf   : > { %1461 = vtanh.f32 %v527_v49  ;;  %1325 = vmatmul.msk.f32.gmra.mxu0 %vm298_vm0, %v250_v47 }
  0xc4   : > { %v529_v50 = vpop.f32.mrf.mxu0 }
  0xc5   : > { %v1462_v52 = vpop.eup %1461  ;;  %v530_v53 = vadd.f32 %v1687_v22, %v529_v50  ;;  %v268_v50 = vld [vmem:[%s1638_s28 + $0x140] sm:$0xff] }
  0xc6   : > { %1373 = vmatmul.msk.f32.gmra.mxu1 %vm772_vm1, %v1462_v52  ;;  %1343 = vmatmul.msk.f32.gmra.mxu3 %vm298_vm0, %v268_v50 }
  0xc7   : > { %1463 = vtanh.f32 %v530_v53  ;;  %1326 = vmatmul.msk.f32.gmra.mxu0 %vm298_vm0, %v251_v51 }
  0xcc   : > { %v532_v54 = vpop.f32.mrf.mxu0 }
  0xcd   : > { %v1464_v56 = vpop.eup %1463  ;;  %v533_v57 = vadd.f32 %v1687_v22, %v532_v54 }
  0xce   : > { %1374 = vmatmul.msk.f32.gmra.mxu1 %vm772_vm1, %v1464_v56  ;;  %v269_v56 = vld [vmem:[%s1638_s28 + $0x148] sm:$0xff] }
  0xcf   : > { %1465 = vtanh.f32 %v533_v57  ;;  %1327 = vmatmul.msk.f32.gmra.mxu0 %vm298_vm0, %v252_v55  ;;  %1344 = vmatmul.msk.f32.gmra.mxu3 %vm298_vm0, %v269_v56  ;;  %v279_v56 = vld [vmem:[%s1638_s28 + $0x198] sm:$0xff] }
  0xd4   : > { %v535_v58 = vpop.f32.mrf.mxu0 }
  0xd5   : > { %v1466_v60 = vpop.eup %1465  ;;  %v536_v61 = vadd.f32 %v1687_v22, %v535_v58 }
  0xd6   : > { %1375 = vmatmul.msk.f32.gmra.mxu1 %vm772_vm1, %v1466_v60 }
  0xd7   : > { %1467 = vtanh.f32 %v536_v61  ;;  %1328 = vmatmul.msk.f32.gmra.mxu0 %vm298_vm0, %v253_v59 }
  0xdc   : > { %v538_v62 = vpop.f32.mrf.mxu0 }
  0xdd   : > { %v1468_v0 = vpop.eup %1467  ;;  %v539_v1 = vadd.f32 %v1687_v22, %v538_v62  ;;  %v270_v62 = vld [vmem:[%s1638_s28 + $0x150] sm:$0xff] }
  0xde   : > { %1376 = vmatmul.msk.f32.gmra.mxu1 %vm772_vm1, %v1468_v0  ;;  %1345 = vmatmul.msk.f32.gmra.mxu3 %vm298_vm0, %v270_v62 }
  0xdf   : > { %1469 = vtanh.f32 %v539_v1  ;;  %1329 = vmatmul.msk.f32.gmra.mxu0 %vm298_vm0, %v254_v63 }
  0xe4   : > { %v541_v2 = vpop.f32.mrf.mxu0 }
  0xe5   : > { %v1470_v4 = vpop.eup %1469  ;;  %v542_v5 = vadd.f32 %v1687_v22, %v541_v2 }
  0xe6   : > { %1377 = vmatmul.msk.f32.gmra.mxu1 %vm772_vm1, %v1470_v4  ;;  %v271_v4 = vld [vmem:[%s1638_s28 + $0x158] sm:$0xff] }
  0xe7   : > { %1471 = vtanh.f32 %v542_v5  ;;  %1330 = vmatmul.msk.f32.gmra.mxu0 %vm298_vm0, %v255_v3  ;;  %1346 = vmatmul.msk.f32.gmra.mxu3 %vm298_vm0, %v271_v4 }
  0xec   : > { %v544_v6 = vpop.f32.mrf.mxu0 }
  0xed   : > { %v1472_v8 = vpop.eup %1471  ;;  %v545_v9 = vadd.f32 %v1687_v22, %v544_v6 }
  0xee   : > { %1378 = vmatmul.msk.f32.gmra.mxu1 %vm772_vm1, %v1472_v8 }
  0xef   : > { %1473 = vtanh.f32 %v545_v9  ;;  %1331 = vmatmul.msk.f32.gmra.mxu0 %vm298_vm0, %v256_v7  ;;  %1347 = vmatmul.msk.f32.gmra.mxu3 %vm298_vm0, %v272_v10 }
  0xf4   : > { %v547_v11 = vpop.f32.mrf.mxu0 }
  0xf5   : > { %v1474_v13 = vpop.eup %1473  ;;  %v548_v14 = vadd.f32 %v1687_v22, %v547_v11 }
  0xf6   : > { %1379 = vmatmul.msk.f32.gmra.mxu1 %vm772_vm1, %v1474_v13 }
  0xf7   : > { %1475 = vtanh.f32 %v548_v14  ;;  %1332 = vmatmul.msk.f32.gmra.mxu0 %vm298_vm0, %v257_v12 }
  0xfc   : > { %v550_v16 = vpop.f32.mrf.mxu0 }
  0xfd   : > { %v1476_v18 = vpop.eup %1475  ;;  %v551_v19 = vadd.f32 %v1687_v22, %v550_v16  ;;  %v273_v16 = vld [vmem:[%s1638_s28 + $0x168] sm:$0xff] }
  0xfe   : > { %1380 = vmatmul.msk.f32.gmra.mxu1 %vm772_vm1, %v1476_v18  ;;  %1348 = vmatmul.msk.f32.gmra.mxu3 %vm298_vm0, %v273_v16 }
  0xff   : > { %1477 = vtanh.f32 %v551_v19  ;;  %1333 = vmatmul.msk.f32.gmra.mxu0 %vm298_vm0, %v258_v17 }
 0x104   : > { %v553_v21 = vpop.f32.mrf.mxu0 }
 0x105   : > { %v1478_v24 = vpop.eup %1477  ;;  %v554_v25 = vadd.f32 %v1687_v22, %v553_v21 }
 0x106   : > { %1381 = vmatmul.msk.f32.gmra.mxu1 %vm772_vm1, %v1478_v24 }
 0x107   : > { %1479 = vtanh.f32 %v554_v25  ;;  %1334 = vmatmul.msk.f32.gmra.mxu0 %vm298_vm0, %v259_v23  ;;  %v274_v23 = vld [vmem:[%s1638_s28 + $0x170] sm:$0xff] }
 0x108   : > { %1349 = vmatmul.msk.f32.gmra.mxu3 %vm298_vm0, %v274_v23 }
 0x10c   : > { %v556_v27 = vpop.f32.mrf.mxu0 }
 0x10d   : > { %v1480_v29 = vpop.eup %1479  ;;  %v557_v30 = vadd.f32 %v1687_v22, %v556_v27 }
 0x10e   : > { %1382 = vmatmul.msk.f32.gmra.mxu1 %vm772_vm1, %v1480_v29  ;;  %v275_v29 = vld [vmem:[%s1638_s28 + $0x178] sm:$0xff] }
 0x10f   : > { %1481 = vtanh.f32 %v557_v30  ;;  %1335 = vmatmul.msk.f32.gmra.mxu0 %vm298_vm0, %v260_v28 }
 0x110   : > { %1350 = vmatmul.msk.f32.gmra.mxu3 %vm298_vm0, %v275_v29 }
 0x113   : > { %v982_v33 = vpop.f32.mrf.mxu1 }
 0x114   : > { %v983_v34 = vadd.f32 %v1768_v32, %v982_v33  ;;  %v559_v35 = vpop.f32.mrf.mxu0 }
 0x115   : > { %v1482_v36 = vpop.eup %1481  ;;  %v560_v37 = vadd.f32 %v1687_v22, %v559_v35 }
 0x116   : > { %1174 = vst.msk [vmem:[%s1776_s19] sm:$0xff] %vm772_vm1, %v983_v34  ;;  %1383 = vmatmul.msk.f32.gmra.mxu1 %vm772_vm1, %v1482_v36  ;;  %v276_v36 = vld [vmem:[%s1638_s28 + $0x180] sm:$0xff] }
 0x117   : > { %1483 = vtanh.f32 %v560_v37 }
 0x118   : > { %1351 = vmatmul.msk.f32.gmra.mxu3 %vm298_vm0, %v276_v36 }
 0x11b   : > { %v985_v39 = vpop.f32.mrf.mxu1 }
 0x11c   : > { %v986_v40 = vadd.f32 %v1768_v32, %v985_v39  ;;  %v562_v41 = vpop.f32.mrf.mxu0 }
 0x11d   : > { %v1484_v42 = vpop.eup %1483  ;;  %v563_v43 = vadd.f32 %v1687_v22, %v562_v41 }
 0x11e   : > { %1175 = vst.msk [vmem:[%s1776_s19 + $0x8] sm:$0xff] %vm772_vm1, %v986_v40  ;;  %1384 = vmatmul.msk.f32.gmra.mxu1 %vm772_vm1, %v1484_v42  ;;  %v277_v42 = vld [vmem:[%s1638_s28 + $0x188] sm:$0xff] }
 0x11f   : > { %1485 = vtanh.f32 %v563_v43 }
 0x120   : > { %1352 = vmatmul.msk.f32.gmra.mxu3 %vm298_vm0, %v277_v42 }
 0x123   : > { %v988_v45 = vpop.f32.mrf.mxu1 }
 0x124   : > { %v989_v46 = vadd.f32 %v1768_v32, %v988_v45  ;;  %v565_v47 = vpop.f32.mrf.mxu0 }
 0x125   : > { %v1486_v48 = vpop.eup %1485  ;;  %v566_v49 = vadd.f32 %v1687_v22, %v565_v47 }
 0x126   : > { %1176 = vst.msk [vmem:[%s1776_s19 + $0x10] sm:$0xff] %vm772_vm1, %v989_v46  ;;  %1385 = vmatmul.msk.f32.gmra.mxu1 %vm772_vm1, %v1486_v48  ;;  %v607_v46 = vpop.f32.mrf.mxu3 }
 0x127   : > { %1487 = vtanh.f32 %v566_v49  ;;  %v278_v49 = vld [vmem:[%s1638_s28 + $0x190] sm:$0xff] }
 0x128   : > { %1353 = vmatmul.msk.f32.gmra.mxu3 %vm298_vm0, %v278_v49 }
 0x12b   : > { %v991_v51 = vpop.f32.mrf.mxu1 }
 0x12c   : > { %v992_v52 = vadd.f32 %v1768_v32, %v991_v51  ;;  %v568_v53 = vpop.f32.mrf.mxu0 }
 0x12d   : > { %v1488_v54 = vpop.eup %1487  ;;  %v569_v55 = vadd.f32 %v1687_v22, %v568_v53 }
 0x12e   : > { %1177 = vst.msk [vmem:[%s1776_s19 + $0x18] sm:$0xff] %vm772_vm1, %v992_v52  ;;  %1386 = vmatmul.msk.f32.gmra.mxu1 %vm772_vm1, %v1488_v54  ;;  %v610_v53 = vpop.f32.mrf.mxu3 }
 0x12f   : > { %1489 = vtanh.f32 %v569_v55 }
 0x130   : > { %1354 = vmatmul.msk.f32.gmra.mxu3 %vm298_vm0, %v279_v56  ;;  %v289_v56 = vld [vmem:[%s1638_s28 + $0x1e8] sm:$0xff] }
 0x133   : > { %v994_v57 = vpop.f32.mrf.mxu1 }
 0x134   : > { %v995_v58 = vadd.f32 %v1768_v32, %v994_v57  ;;  %v571_v59 = vpop.f32.mrf.mxu0 }
 0x135   : > { %v1490_v60 = vpop.eup %1489  ;;  %v572_v61 = vadd.f32 %v1687_v22, %v571_v59 }
 0x136   : > { %1178 = vst.msk [vmem:[%s1776_s19 + $0x20] sm:$0xff] %vm772_vm1, %v995_v58  ;;  %1387 = vmatmul.msk.f32.gmra.mxu1 %vm772_vm1, %v1490_v60  ;;  %v613_v60 = vpop.f32.mrf.mxu3 }
 0x137   : > { %1491 = vtanh.f32 %v572_v61 }
 0x13b   : > { %v997_v63 = vpop.f32.mrf.mxu1 }
 0x13c   : > { %v998_v0 = vadd.f32 %v1768_v32, %v997_v63  ;;  %v574_v1 = vpop.f32.mrf.mxu0  ;;  %v280_v63 = vld [vmem:[%s1638_s28 + $0x1a0] sm:$0xff] }
 0x13d   : > { %v1492_v2 = vpop.eup %1491  ;;  %v575_v3 = vadd.f32 %v1687_v22, %v574_v1  ;;  %1355 = vmatmul.msk.f32.gmra.mxu3 %vm298_vm0, %v280_v63 }
 0x13e   : > { %1179 = vst.msk [vmem:[%s1776_s19 + $0x28] sm:$0xff] %vm772_vm1, %v998_v0  ;;  %1388 = vmatmul.msk.f32.gmra.mxu1 %vm772_vm1, %v1492_v2 }
 0x13f   : > { %1493 = vtanh.f32 %v575_v3  ;;  %v616_v3 = vpop.f32.mrf.mxu3 }
 0x143   : > { %v1000_v5 = vpop.f32.mrf.mxu1 }
 0x144   : > { %v1001_v6 = vadd.f32 %v1768_v32, %v1000_v5  ;;  %v577_v7 = vpop.f32.mrf.mxu0 }
 0x145   : > { %v1494_v8 = vpop.eup %1493  ;;  %v578_v9 = vadd.f32 %v1687_v22, %v577_v7  ;;  %v608_v7 = vadd.f32 %v1687_v22, %v607_v46 }
 0x146   : > { %1180 = vst.msk [vmem:[%s1776_s19 + $0x30] sm:$0xff] %vm772_vm1, %v1001_v6  ;;  %1389 = vmatmul.msk.f32.gmra.mxu1 %vm772_vm1, %v1494_v8  ;;  %v281_v6 = vld [vmem:[%s1638_s28 + $0x1a8] sm:$0xff] }
 0x147   : > { %1495 = vtanh.f32 %v578_v9  ;;  %1356 = vmatmul.msk.f32.gmra.mxu3 %vm298_vm0, %v281_v6  ;;  %v619_v10 = vpop.f32.mrf.mxu3 }
 0x14b   : > { %v1003_v11 = vpop.f32.mrf.mxu1 }
 0x14c   : > { %v1004_v12 = vadd.f32 %v1768_v32, %v1003_v11  ;;  %v580_v13 = vpop.f32.mrf.mxu0 }
 0x14d   : > { %v1496_v14 = vpop.eup %1495  ;;  %v581_v15 = vadd.f32 %v1687_v22, %v580_v13  ;;  %v611_v13 = vadd.f32 %v1687_v22, %v610_v53 }
 0x14e   : > { %1181 = vst.msk [vmem:[%s1776_s19 + $0x38] sm:$0xff] %vm772_vm1, %v1004_v12  ;;  %1390 = vmatmul.msk.f32.gmra.mxu1 %vm772_vm1, %v1496_v14  ;;  %v282_v12 = vld [vmem:[%s1638_s28 + $0x1b0] sm:$0xff] }
 0x14f   : > { %1497 = vtanh.f32 %v581_v15  ;;  %1357 = vmatmul.msk.f32.gmra.mxu3 %vm298_vm0, %v282_v12 }
 0x153   : > { %v1006_v17 = vpop.f32.mrf.mxu1 }
 0x154   : > { %v1007_v18 = vadd.f32 %v1768_v32, %v1006_v17  ;;  %v583_v19 = vpop.f32.mrf.mxu0  ;;  %v622_v17 = vpop.f32.mrf.mxu3 }
 0x155   : > { %v1498_v20 = vpop.eup %1497  ;;  %v584_v21 = vadd.f32 %v1687_v22, %v583_v19  ;;  %v614_v19 = vadd.f32 %v1687_v22, %v613_v60 }
 0x156   : > { %1182 = vst.msk [vmem:[%s1776_s19 + $0x40] sm:$0xff] %vm772_vm1, %v1007_v18  ;;  %1391 = vmatmul.msk.f32.gmra.mxu1 %vm772_vm1, %v1498_v20  ;;  %v283_v18 = vld [vmem:[%s1638_s28 + $0x1b8] sm:$0xff] }
 0x157   : > { %1499 = vtanh.f32 %v584_v21  ;;  %1358 = vmatmul.msk.f32.gmra.mxu3 %vm298_vm0, %v283_v18 }
 0x15b   : > { %v1009_v24 = vpop.f32.mrf.mxu1 }
 0x15c   : > { %v1010_v25 = vadd.f32 %v1768_v32, %v1009_v24  ;;  %v586_v26 = vpop.f32.mrf.mxu0  ;;  %v625_v24 = vpop.f32.mrf.mxu3 }
 0x15d   : > { %v1500_v27 = vpop.eup %1499  ;;  %v587_v28 = vadd.f32 %v1687_v22, %v586_v26  ;;  %v617_v26 = vadd.f32 %v1687_v22, %v616_v3 }
 0x15e   : > { %1183 = vst.msk [vmem:[%s1776_s19 + $0x48] sm:$0xff] %vm772_vm1, %v1010_v25  ;;  %1392 = vmatmul.msk.f32.gmra.mxu1 %vm772_vm1, %v1500_v27  ;;  %v284_v25 = vld [vmem:[%s1638_s28 + $0x1c0] sm:$0xff] }
 0x15f   : > { %1501 = vtanh.f32 %v587_v28  ;;  %1359 = vmatmul.msk.f32.gmra.mxu3 %vm298_vm0, %v284_v25 }
 0x163   : > { %v1012_v30 = vpop.f32.mrf.mxu1 }
 0x164   : > { %v1013_v31 = vadd.f32 %v1768_v32, %v1012_v30  ;;  %v589_v33 = vpop.f32.mrf.mxu0  ;;  %v628_v30 = vpop.f32.mrf.mxu3 }
 0x165   : > { %v1502_v34 = vpop.eup %1501  ;;  %v590_v35 = vadd.f32 %v1687_v22, %v589_v33  ;;  %v620_v33 = vadd.f32 %v1687_v22, %v619_v10 }
 0x166   : > { %1184 = vst.msk [vmem:[%s1776_s19 + $0x50] sm:$0xff] %vm772_vm1, %v1013_v31  ;;  %1393 = vmatmul.msk.f32.gmra.mxu1 %vm772_vm1, %v1502_v34  ;;  %v285_v31 = vld [vmem:[%s1638_s28 + $0x1c8] sm:$0xff] }
 0x167   : > { %1503 = vtanh.f32 %v590_v35  ;;  %1360 = vmatmul.msk.f32.gmra.mxu3 %vm298_vm0, %v285_v31 }
 0x16b   : > { %v1015_v37 = vpop.f32.mrf.mxu1 }
 0x16c   : > { %v1016_v38 = vadd.f32 %v1768_v32, %v1015_v37  ;;  %v592_v39 = vpop.f32.mrf.mxu0  ;;  %v631_v37 = vpop.f32.mrf.mxu3 }
 0x16d   : > { %v1504_v40 = vpop.eup %1503  ;;  %v593_v41 = vadd.f32 %v1687_v22, %v592_v39  ;;  %v623_v39 = vadd.f32 %v1687_v22, %v622_v17 }
 0x16e   : > { %1185 = vst.msk [vmem:[%s1776_s19 + $0x58] sm:$0xff] %vm772_vm1, %v1016_v38  ;;  %1394 = vmatmul.msk.f32.gmra.mxu1 %vm772_vm1, %v1504_v40  ;;  %v286_v38 = vld [vmem:[%s1638_s28 + $0x1d0] sm:$0xff] }
 0x16f   : > { %1505 = vtanh.f32 %v593_v41  ;;  %1361 = vmatmul.msk.f32.gmra.mxu3 %vm298_vm0, %v286_v38 }
 0x173   : > { %v1018_v43 = vpop.f32.mrf.mxu1 }
 0x174   : > { %v1019_v44 = vadd.f32 %v1768_v32, %v1018_v43  ;;  %v595_v45 = vpop.f32.mrf.mxu0  ;;  %v634_v43 = vpop.f32.mrf.mxu3 }
 0x175   : > { %v1506_v47 = vpop.eup %1505  ;;  %v596_v48 = vadd.f32 %v1687_v22, %v595_v45  ;;  %v626_v45 = vadd.f32 %v1687_v22, %v625_v24  ;;  %v635_v63 = vadd.f32 %v1687_v22, %v634_v43 }
 0x176   : > { %1186 = vst.msk [vmem:[%s1776_s19 + $0x60] sm:$0xff] %vm772_vm1, %v1019_v44  ;;  %1395 = vmatmul.msk.f32.gmra.mxu1 %vm772_vm1, %v1506_v47  ;;  %v287_v44 = vld [vmem:[%s1638_s28 + $0x1d8] sm:$0xff] }
 0x177   : > { %1507 = vtanh.f32 %v596_v48  ;;  %1362 = vmatmul.msk.f32.gmra.mxu3 %vm298_vm0, %v287_v44 }
 0x17b   : > { %v1021_v50 = vpop.f32.mrf.mxu1 }
 0x17c   : > { %v1022_v51 = vadd.f32 %v1768_v32, %v1021_v50  ;;  %v598_v52 = vpop.f32.mrf.mxu0  ;;  %v637_v49 = vpop.f32.mrf.mxu3  ;;  %v288_v50 = vld [vmem:[%s1638_s28 + $0x1e0] sm:$0xff] }
 0x17d   : > { %v1508_v54 = vpop.eup %1507  ;;  %v599_v55 = vadd.f32 %v1687_v22, %v598_v52 }
 0x17e   : > { %1187 = vst.msk [vmem:[%s1776_s19 + $0x68] sm:$0xff] %vm772_vm1, %v1022_v51  ;;  %1396 = vmatmul.msk.f32.gmra.mxu1 %vm772_vm1, %v1508_v54  ;;  %v629_v51 = vadd.f32 %v1687_v22, %v628_v30 }
 0x17f   : > { %1509 = vtanh.f32 %v599_v55  ;;  %1363 = vmatmul.msk.f32.gmra.mxu3 %vm298_vm0, %v288_v50 }
 0x183   : > { %v1024_v57 = vpop.f32.mrf.mxu1 }
 0x184   : > { %v1025_v58 = vadd.f32 %v1768_v32, %v1024_v57  ;;  %v601_v59 = vpop.f32.mrf.mxu0  ;;  %v640_v55 = vpop.f32.mrf.mxu3  ;;  %v632_v57 = vadd.f32 %v1687_v22, %v631_v37 }
 0x185   : > { %v1510_v61 = vpop.eup %1509  ;;  %v602_v62 = vadd.f32 %v1687_v22, %v601_v59  ;;  %v641_v10 = vadd.f32 %v1687_v22, %v640_v55 }
 0x186   : > { %1188 = vst.msk [vmem:[%s1776_s19 + $0x70] sm:$0xff] %vm772_vm1, %v1025_v58  ;;  %1397 = vmatmul.msk.f32.gmra.mxu1 %vm772_vm1, %v1510_v61 }
 0x187   : > { %1511 = vtanh.f32 %v602_v62  ;;  %1364 = vmatmul.msk.f32.gmra.mxu3 %vm298_vm0, %v289_v56  ;;  %v290_v62 = vld [vmem:[%s1638_s28 + $0x1f0] sm:$0xff] }
 0x18b   : > { %v1027_v0 = vpop.f32.mrf.mxu1 }
 0x18c   : > { %v1028_v1 = vadd.f32 %v1768_v32, %v1027_v0  ;;  %v604_v2 = vpop.f32.mrf.mxu0  ;;  %v643_v61 = vpop.f32.mrf.mxu3 }
 0x18d   : > { %v1512_v4 = vpop.eup %1511  ;;  %v605_v5 = vadd.f32 %v1687_v22, %v604_v2 }
 0x18e   : > { %1189 = vst.msk [vmem:[%s1776_s19 + $0x78] sm:$0xff] %vm772_vm1, %v1028_v1  ;;  %1398 = vmatmul.msk.f32.gmra.mxu1 %vm772_vm1, %v1512_v4  ;;  %v291_v4 = vld [vmem:[%s1638_s28 + $0x1f8] sm:$0xff] }
 0x18f   : > { %1513 = vtanh.f32 %v605_v5  ;;  %1365 = vmatmul.msk.f32.gmra.mxu3 %vm298_vm0, %v290_v62  ;;  %v638_v5 = vadd.f32 %v1687_v22, %v637_v49 }
 0x190   : > { %1515 = vtanh.f32 %v608_v7 }
 0x191   : > { %1517 = vtanh.f32 %v611_v13 }
 0x192   : > { %1519 = vtanh.f32 %v614_v19 }
 0x193   : > { %v1030_v8 = vpop.f32.mrf.mxu1  ;;  %1521 = vtanh.f32 %v617_v26 }
 0x194   : > { %v1031_v9 = vadd.f32 %v1768_v32, %v1030_v8  ;;  %1523 = vtanh.f32 %v620_v33  ;;  %v646_v3 = vpop.f32.mrf.mxu3 }
 0x195   : > { %v1514_v11 = vpop.eup %1513  ;;  %1525 = vtanh.f32 %v623_v39 }
 0x196   : > { %1190 = vst.msk [vmem:[%s1776_s19 + $0x80] sm:$0xff] %vm772_vm1, %v1031_v9  ;;  %1399 = vmatmul.msk.f32.vlgmr.msra.gmra.mxu2 %vm772_vm1, %v1514_v11  ;;  %v1516_v14 = vpop.eup %1515  ;;  %1527 = vtanh.f32 %v626_v45 }
 0x197   : > { %v1518_v20 = vpop.eup %1517  ;;  %1529 = vtanh.f32 %v629_v51  ;;  %1366 = vmatmul.msk.f32.gmra.mxu3 %vm298_vm0, %v291_v4 }
 0x198   : > { %v1520_v27 = vpop.eup %1519  ;;  %1531 = vtanh.f32 %v632_v57 }
 0x199   : > { %v1522_v34 = vpop.eup %1521  ;;  %1533 = vtanh.f32 %v635_v63 }
 0x19a   : > { %v1524_v40 = vpop.eup %1523  ;;  %1535 = vtanh.f32 %v638_v5 }
 0x19b   : > { %v1033_v15 = vpop.f32.mrf.mxu1  ;;  %v1526_v46 = vpop.eup %1525  ;;  %1537 = vtanh.f32 %v641_v10 }
 0x19c   : > { %v1034_v16 = vadd.f32 %v1768_v32, %v1033_v15  ;;  %v1528_v52 = vpop.eup %1527  ;;  %v649_v9 = vpop.f32.mrf.mxu3  ;;  %v644_v15 = vadd.f32 %v1687_v22, %v643_v61 }
 0x19d   : > { %v1530_v58 = vpop.eup %1529  ;;  %v650_v26 = vadd.f32 %v1687_v22, %v649_v9 }
 0x19e   : > { %1191 = vst.msk [vmem:[%s1776_s19 + $0x88] sm:$0xff] %vm772_vm1, %v1034_v16  ;;  %1400 = vmatmul.msk.f32.gmra.mxu2 %vm772_vm1, %v1516_v14  ;;  %v1532_v0 = vpop.eup %1531  ;;  %1539 = vtanh.f32 %v644_v15 }
 0x19f   : > { %v1534_v6 = vpop.eup %1533 }
 0x1a0   : > { %v1536_v11 = vpop.eup %1535 }
 0x1a1   : > { %v1538_v16 = vpop.eup %1537 }
 0x1a3   : > { %v1036_v21 = vpop.f32.mrf.mxu1 }
 0x1a4   : > { %v1037_v23 = vadd.f32 %v1768_v32, %v1036_v21  ;;  %v652_v14 = vpop.f32.mrf.mxu3  ;;  %v1540_v21 = vpop.eup %1539 }
 0x1a5   : > { %v653_v31 = vadd.f32 %v1687_v22, %v652_v14 }
 0x1a6   : > { %1192 = vst.msk [vmem:[%s1776_s19 + $0x90] sm:$0xff] %vm772_vm1, %v1037_v23  ;;  %1401 = vmatmul.msk.f32.gmra.mxu2 %vm772_vm1, %v1518_v20  ;;  %v647_v20 = vadd.f32 %v1687_v22, %v646_v3 }
 0x1a8   : > { %1541 = vtanh.f32 %v647_v20  ;;  %v1577_v20 = vld [vmem:[%s2120_s2] ss:$0 sm:$0xff] }
 0x1a9   : > { %1543 = vtanh.f32 %v650_v26 }
 0x1aa   : > { %1545 = vtanh.f32 %v653_v31 }
 0x1ab   : > { %v1039_v28 = vpop.f32.mrf.mxu1 }
 0x1ac   : > { %v1040_v29 = vadd.f32 %v1768_v32, %v1039_v28  ;;  %v655_v19 = vpop.f32.mrf.mxu3 }
 0x1ad   : > { %v656_v37 = vadd.f32 %v1687_v22, %v655_v19 }
 0x1ae   : > { %1193 = vst.msk [vmem:[%s1776_s19 + $0x98] sm:$0xff] %vm772_vm1, %v1040_v29  ;;  %1402 = vmatmul.msk.f32.gmra.mxu2 %vm772_vm1, %v1520_v27  ;;  %v1542_v27 = vpop.eup %1541 }
 0x1af   : > { %v1544_v33 = vpop.eup %1543  ;;  %1547 = vtanh.f32 %v656_v37 }
 0x1b0   : > { %v1546_v38 = vpop.eup %1545 }
 0x1b3   : > { %v1042_v35 = vpop.f32.mrf.mxu1 }
 0x1b4   : > { %v1043_v36 = vadd.f32 %v1768_v32, %v1042_v35  ;;  %v658_v25 = vpop.f32.mrf.mxu3 }
 0x1b5   : > { %v1548_v43 = vpop.eup %1547 }
 0x1b6   : > { %1194 = vst.msk [vmem:[%s1776_s19 + $0xa0] sm:$0xff] %vm772_vm1, %v1043_v36  ;;  %1403 = vmatmul.msk.f32.gmra.mxu2 %vm772_vm1, %v1522_v34 }
 0x1bb   : > { %v1045_v41 = vpop.f32.mrf.mxu1 }
 0x1bc   : > { %v1046_v42 = vadd.f32 %v1768_v32, %v1045_v41  ;;  %v661_v30 = vpop.f32.mrf.mxu3 }
 0x1bd   : > { %v662_v45 = vadd.f32 %v1687_v22, %v661_v30 }
 0x1be   : > { %1195 = vst.msk [vmem:[%s1776_s19 + $0xa8] sm:$0xff] %vm772_vm1, %v1046_v42  ;;  %1404 = vmatmul.msk.f32.gmra.mxu2 %vm772_vm1, %v1524_v40  ;;  %v659_v40 = vadd.f32 %v1687_v22, %v658_v25 }
 0x1c0   : > { %1549 = vtanh.f32 %v659_v40 }
 0x1c1   : > { %1551 = vtanh.f32 %v662_v45 }
 0x1c3   : > { %v1048_v47 = vpop.f32.mrf.mxu1 }
 0x1c4   : > { %v1049_v48 = vadd.f32 %v1768_v32, %v1048_v47  ;;  %v664_v36 = vpop.f32.mrf.mxu3 }
 0x1c5   : > { %v665_v50 = vadd.f32 %v1687_v22, %v664_v36 }
 0x1c6   : > { %1196 = vst.msk [vmem:[%s1776_s19 + $0xb0] sm:$0xff] %vm772_vm1, %v1049_v48  ;;  %1405 = vmatmul.msk.f32.gmra.mxu2 %vm772_vm1, %v1526_v46  ;;  %v1550_v47 = vpop.eup %1549 }
 0x1c7   : > { %1553 = vtanh.f32 %v665_v50 }
 0x1cb   : > { %v1051_v53 = vpop.f32.mrf.mxu1 }
 0x1cc   : > { %v1052_v54 = vadd.f32 %v1768_v32, %v1051_v53  ;;  %v667_v42 = vpop.f32.mrf.mxu3 }
 0x1cd   : > { %v668_v55 = vadd.f32 %v1687_v22, %v667_v42 }
 0x1ce   : > { %1197 = vst.msk [vmem:[%s1776_s19 + $0xb8] sm:$0xff] %vm772_vm1, %v1052_v54  ;;  %1406 = vmatmul.msk.f32.gmra.mxu2 %vm772_vm1, %v1528_v52  ;;  %v1552_v52 = vpop.eup %1551 }
 0x1cf   : > { %v1554_v57 = vpop.eup %1553  ;;  %1555 = vtanh.f32 %v668_v55 }
 0x1d3   : > { %v1054_v59 = vpop.f32.mrf.mxu1 }
 0x1d4   : > { %v1055_v60 = vadd.f32 %v1768_v32, %v1054_v59  ;;  %v670_v48 = vpop.f32.mrf.mxu3 }
 0x1d5   : > { %v1556_v62 = vpop.eup %1555 }
 0x1d6   : > { %1198 = vst.msk [vmem:[%s1776_s19 + $0xc0] sm:$0xff] %vm772_vm1, %v1055_v60  ;;  %1407 = vmatmul.msk.f32.gmra.mxu2 %vm772_vm1, %v1530_v58  ;;  %v671_v60 = vadd.f32 %v1687_v22, %v670_v48 }
 0x1d8   : > { %1557 = vtanh.f32 %v671_v60 }
 0x1db   : > { %v1057_v1 = vpop.f32.mrf.mxu1 }
 0x1dc   : > { %v1058_v2 = vadd.f32 %v1768_v32, %v1057_v1  ;;  %v673_v53 = vpop.f32.mrf.mxu3 }
 0x1de   : > { %1199 = vst.msk [vmem:[%s1776_s19 + $0xc8] sm:$0xff] %vm772_vm1, %v1058_v2  ;;  %1408 = vmatmul.msk.f32.gmra.mxu2 %vm772_vm1, %v1532_v0  ;;  %v674_v0 = vadd.f32 %v1687_v22, %v673_v53  ;;  %v1558_v3 = vpop.eup %1557 }
 0x1e0   : > { %1559 = vtanh.f32 %v674_v0 }
 0x1e3   : > { %v1060_v7 = vpop.f32.mrf.mxu1 }
 0x1e4   : > { %v1061_v8 = vadd.f32 %v1768_v32, %v1060_v7  ;;  %v676_v58 = vpop.f32.mrf.mxu3 }
 0x1e5   : > { %v677_v5 = vadd.f32 %v1687_v22, %v676_v58 }
 0x1e6   : > { %1200 = vst.msk [vmem:[%s1776_s19 + $0xd0] sm:$0xff] %vm772_vm1, %v1061_v8  ;;  %1409 = vmatmul.msk.f32.gmra.mxu2 %vm772_vm1, %v1534_v6  ;;  %v1560_v7 = vpop.eup %1559 }
 0x1e7   : > { %1561 = vtanh.f32 %v677_v5 }
 0x1eb   : > { %v1063_v12 = vpop.f32.mrf.mxu1 }
 0x1ec   : > { %v1064_v13 = vadd.f32 %v1768_v32, %v1063_v12  ;;  %v679_v2 = vpop.f32.mrf.mxu3 }
 0x1ed   : > { %v680_v10 = vadd.f32 %v1687_v22, %v679_v2  ;;  %v1562_v12 = vpop.eup %1561 }
 0x1ee   : > { %1201 = vst.msk [vmem:[%s1776_s19 + $0xd8] sm:$0xff] %vm772_vm1, %v1064_v13  ;;  %1410 = vmatmul.msk.f32.gmra.mxu2 %vm772_vm1, %v1536_v11 }
 0x1ef   : > { %1563 = vtanh.f32 %v680_v10 }
 0x1f3   : > { %v1066_v17 = vpop.f32.mrf.mxu1 }
 0x1f4   : > { %v1067_v18 = vadd.f32 %v1768_v32, %v1066_v17  ;;  %v682_v8 = vpop.f32.mrf.mxu3 }
 0x1f5   : > { %v683_v15 = vadd.f32 %v1687_v22, %v682_v8  ;;  %v1564_v17 = vpop.eup %1563 }
 0x1f6   : > { %1202 = vst.msk [vmem:[%s1776_s19 + $0xe0] sm:$0xff] %vm772_vm1, %v1067_v18  ;;  %1411 = vmatmul.msk.f32.gmra.mxu2 %vm772_vm1, %v1538_v16 }
 0x1f7   : > { %1565 = vtanh.f32 %v683_v15 }
 0x1fb   : > { %v1069_v23 = vpop.f32.mrf.mxu1 }
 0x1fc   : > { %v1070_v24 = vadd.f32 %v1768_v32, %v1069_v23  ;;  %v685_v13 = vpop.f32.mrf.mxu3 }
 0x1fe   : > { %1203 = vst.msk [vmem:[%s1776_s19 + $0xe8] sm:$0xff] %vm772_vm1, %v1070_v24  ;;  %1412 = vmatmul.msk.f32.gmra.mxu2 %vm772_vm1, %v1540_v21  ;;  %v686_v21 = vadd.f32 %v1577_v20, %v685_v13  ;;  %v1566_v24 = vpop.eup %1565 }
 0x200   : > { %1567 = vtanh.f32 %v686_v21 }
 0x203   : > { %v1072_v28 = vpop.f32.mrf.mxu1 }
 0x204   : > { %v1073_v29 = vadd.f32 %v1768_v32, %v1072_v28  ;;  %v688_v18 = vpop.f32.mrf.mxu3 }
 0x205   : > { %v689_v25 = vadd.f32 %v1577_v20, %v688_v18 }
 0x206   : > { %1204 = vst.msk [vmem:[%s1776_s19 + $0xf0] sm:$0xff] %vm772_vm1, %v1073_v29  ;;  %1413 = vmatmul.msk.f32.gmra.mxu2 %vm772_vm1, %v1542_v27  ;;  %v1568_v28 = vpop.eup %1567 }
 0x207   : > { %1569 = vtanh.f32 %v689_v25 }
 0x20b   : > { %v1075_v34 = vpop.f32.mrf.mxu1 }
 0x20c   : > { %v1076_v35 = vadd.f32 %v1768_v32, %v1075_v34  ;;  %v691_v27 = vpop.f32.mrf.mxu3 }
 0x20d   : > { %v692_v30 = vadd.f32 %v1577_v20, %v691_v27 }
 0x20e   : > { %1205 = vst.msk [vmem:[%s1776_s19 + $0xf8] sm:$0xff] %vm772_vm1, %v1076_v35  ;;  %1414 = vmatmul.msk.f32.gmra.mxu2 %vm772_vm1, %v1544_v33  ;;  %v1570_v33 = vpop.eup %1569 }
 0x20f   : > { %1571 = vtanh.f32 %v692_v30 }
 0x214   : > { %v694_v34 = vpop.f32.mrf.mxu3 }
 0x215   : > { %v695_v36 = vadd.f32 %v1577_v20, %v694_v34 }
 0x216   : > { %1415 = vmatmul.msk.f32.gmra.mxu2 %vm772_vm1, %v1546_v38  ;;  %v1572_v38 = vpop.eup %1571 }
 0x217   : > { %1573 = vtanh.f32 %v695_v36 }
 0x219   : > { %v1078_v39 = vpop.f32.mrf.mxu2 }
 0x21a   : > { %v1079_v41 = vadd.f32 %v1768_v32, %v1078_v39 }
 0x21c   : > { %1206 = vst.msk [vmem:[%s1776_s19 + $0x100] sm:$0xff] %vm772_vm1, %v1079_v41  ;;  %v697_v39 = vpop.f32.mrf.mxu3 }
 0x21d   : > { %v698_v41 = vadd.f32 %v1577_v20, %v697_v39 }
 0x21e   : > { %1416 = vmatmul.msk.f32.gmra.mxu2 %vm772_vm1, %v1548_v43  ;;  %v1574_v43 = vpop.eup %1573 }
 0x21f   : > { %1575 = vtanh.f32 %v698_v41 }
 0x221   : > { %v1081_v44 = vpop.f32.mrf.mxu2 }
 0x222   : > { %v1082_v46 = vadd.f32 %v1768_v32, %v1081_v44 }
 0x224   : > { %1207 = vst.msk [vmem:[%s1776_s19 + $0x108] sm:$0xff] %vm772_vm1, %v1082_v46 }
 0x225   : > { %v1576_v46 = vpop.eup %1575 }
 0x226   : > { %1417 = vmatmul.msk.f32.gmra.mxu2 %vm772_vm1, %v1550_v47 }
 0x229   : > { %v1084_v49 = vpop.f32.mrf.mxu2 }
 0x22a   : > { %v1085_v51 = vadd.f32 %v1768_v32, %v1084_v49 }
 0x22c   : > { %1208 = vst.msk [vmem:[%s1776_s19 + $0x110] sm:$0xff] %vm772_vm1, %v1085_v51 }
 0x22e   : > { %1418 = vmatmul.msk.f32.gmra.mxu2 %vm772_vm1, %v1552_v52 }
 0x231   : > { %v1087_v54 = vpop.f32.mrf.mxu2 }
 0x232   : > { %v1088_v56 = vadd.f32 %v1768_v32, %v1087_v54 }
 0x234   : > { %1209 = vst.msk [vmem:[%s1776_s19 + $0x118] sm:$0xff] %vm772_vm1, %v1088_v56 }
 0x236   : > { %1419 = vmatmul.msk.f32.gmra.mxu2 %vm772_vm1, %v1554_v57 }
 0x239   : > { %v1090_v59 = vpop.f32.mrf.mxu2 }
 0x23a   : > { %v1091_v61 = vadd.f32 %v1768_v32, %v1090_v59 }
 0x23c   : > { %1210 = vst.msk [vmem:[%s1776_s19 + $0x120] sm:$0xff] %vm772_vm1, %v1091_v61 }
 0x23e   : > { %1420 = vmatmul.msk.f32.gmra.mxu2 %vm772_vm1, %v1556_v62 }
 0x241   : > { %v1093_v63 = vpop.f32.mrf.mxu2 }
 0x242   : > { %v1094_v1 = vadd.f32 %v1768_v32, %v1093_v63 }
 0x244   : > { %1211 = vst.msk [vmem:[%s1776_s19 + $0x128] sm:$0xff] %vm772_vm1, %v1094_v1 }
 0x246   : > { %1421 = vmatmul.msk.f32.gmra.mxu2 %vm772_vm1, %v1558_v3 }
 0x249   : > { %v1096_v4 = vpop.f32.mrf.mxu2 }
 0x24a   : > { %v1097_v6 = vadd.f32 %v1768_v32, %v1096_v4 }
 0x24c   : > { %1212 = vst.msk [vmem:[%s1776_s19 + $0x130] sm:$0xff] %vm772_vm1, %v1097_v6 }
 0x24e   : > { %1422 = vmatmul.msk.f32.gmra.mxu2 %vm772_vm1, %v1560_v7 }
 0x251   : > { %v1099_v9 = vpop.f32.mrf.mxu2 }
 0x252   : > { %v1100_v11 = vadd.f32 %v1768_v32, %v1099_v9 }
 0x254   : > { %1213 = vst.msk [vmem:[%s1776_s19 + $0x138] sm:$0xff] %vm772_vm1, %v1100_v11 }
 0x256   : > { %1423 = vmatmul.msk.f32.gmra.mxu2 %vm772_vm1, %v1562_v12 }
 0x259   : > { %v1102_v14 = vpop.f32.mrf.mxu2 }
 0x25a   : > { %v1103_v16 = vadd.f32 %v1768_v32, %v1102_v14 }
 0x25c   : > { %1214 = vst.msk [vmem:[%s1776_s19 + $0x140] sm:$0xff] %vm772_vm1, %v1103_v16 }
 0x25e   : > { %1424 = vmatmul.msk.f32.gmra.mxu2 %vm772_vm1, %v1564_v17 }
 0x261   : > { %v1105_v19 = vpop.f32.mrf.mxu2 }
 0x262   : > { %v1106_v23 = vadd.f32 %v1768_v32, %v1105_v19 }
 0x264   : > { %1215 = vst.msk [vmem:[%s1776_s19 + $0x148] sm:$0xff] %vm772_vm1, %v1106_v23 }
 0x266   : > { %1425 = vmatmul.msk.f32.gmra.mxu2 %vm772_vm1, %v1566_v24 }
 0x269   : > { %v1108_v22 = vpop.f32.mrf.mxu2 }
 0x26a   : > { %v1109_v26 = vadd.f32 %v1768_v32, %v1108_v22 }
 0x26c   : > { %1216 = vst.msk [vmem:[%s1776_s19 + $0x150] sm:$0xff] %vm772_vm1, %v1109_v26 }
 0x26e   : > { %1426 = vmatmul.msk.f32.gmra.mxu2 %vm772_vm1, %v1568_v28 }
 0x271   : > { %v1111_v29 = vpop.f32.mrf.mxu2 }
 0x272   : > { %v1112_v31 = vadd.f32 %v1768_v32, %v1111_v29 }
 0x274   : > { %1217 = vst.msk [vmem:[%s1776_s19 + $0x158] sm:$0xff] %vm772_vm1, %v1112_v31 }
 0x276   : > { %1427 = vmatmul.msk.f32.gmra.mxu2 %vm772_vm1, %v1570_v33 }
 0x279   : > { %v1114_v35 = vpop.f32.mrf.mxu2 }
 0x27a   : > { %v1115_v37 = vadd.f32 %v1768_v32, %v1114_v35 }
 0x27c   : > { %1218 = vst.msk [vmem:[%s1776_s19 + $0x160] sm:$0xff] %vm772_vm1, %v1115_v37 }
 0x27e   : > { %1428 = vmatmul.msk.f32.gmra.mxu2 %vm772_vm1, %v1572_v38 }
 0x281   : > { %v1117_v40 = vpop.f32.mrf.mxu2 }
 0x282   : > { %v1118_v42 = vadd.f32 %v1768_v32, %v1117_v40 }
 0x284   : > { %1219 = vst.msk [vmem:[%s1776_s19 + $0x168] sm:$0xff] %vm772_vm1, %v1118_v42 }
 0x286   : > { %1429 = vmatmul.msk.f32.gmra.mxu2 %vm772_vm1, %v1574_v43 }
 0x289   : > { %v1120_v44 = vpop.f32.mrf.mxu2 }
 0x28a   : > { %v1121_v45 = vadd.f32 %v1768_v32, %v1120_v44 }
 0x28c   : > { %1220 = vst.msk [vmem:[%s1776_s19 + $0x170] sm:$0xff] %vm772_vm1, %v1121_v45 }
 0x28e   : > { %1430 = vmatmul.msk.f32.gmra.mxu2 %vm772_vm1, %v1576_v46 }
 0x291   : > { %v1123_v47 = vpop.f32.mrf.mxu2 }
 0x292   : > { %v1124_v48 = vadd.f32 %v1768_v32, %v1123_v47 }
 0x294   : > { %1221 = vst.msk [vmem:[%s1776_s19 + $0x178] sm:$0xff] %vm772_vm1, %v1124_v48 }
 0x299   : > { %v1126_v49 = vpop.f32.mrf.mxu2 }
 0x29a   : > { %v1127_v50 = vadd.f32 %v1768_v32, %v1126_v49 }
 0x29c   : > { %1222 = vst.msk [vmem:[%s1776_s19 + $0x180] sm:$0xff] %vm772_vm1, %v1127_v50 }
 0x2a1   : > { %v1129_v51 = vpop.f32.mrf.mxu2 }
 0x2a2   : > { %v1130_v52 = vadd.f32 %v1768_v32, %v1129_v51 }
 0x2a4   : > { %1223 = vst.msk [vmem:[%s1776_s19 + $0x188] sm:$0xff] %vm772_vm1, %v1130_v52 }
 0x2a9   : > { %v1132_v53 = vpop.f32.mrf.mxu2 }
 0x2aa   : > { %v1133_v54 = vadd.f32 %v1768_v32, %v1132_v53 }
 0x2ac   : > { %1224 = vst.msk [vmem:[%s1776_s19 + $0x190] sm:$0xff] %vm772_vm1, %v1133_v54 }
 0x2b1   : > { %v1135_v55 = vpop.f32.mrf.mxu2 }
 0x2b2   : > { %v1136_v56 = vadd.f32 %v1768_v32, %v1135_v55 }
 0x2b4   : > { %1225 = vst.msk [vmem:[%s1776_s19 + $0x198] sm:$0xff] %vm772_vm1, %v1136_v56 }
 0x2b9   : > { %v1138_v57 = vpop.f32.mrf.mxu2 }
 0x2ba   : > { %v1139_v58 = vadd.f32 %v1768_v32, %v1138_v57 }
 0x2bc   : > { %1226 = vst.msk [vmem:[%s1776_s19 + $0x1a0] sm:$0xff] %vm772_vm1, %v1139_v58 }
 0x2c1   : > { %v1141_v59 = vpop.f32.mrf.mxu2 }
 0x2c2   : > { %v1142_v60 = vadd.f32 %v1768_v32, %v1141_v59 }
 0x2c4   : > { %1227 = vst.msk [vmem:[%s1776_s19 + $0x1a8] sm:$0xff] %vm772_vm1, %v1142_v60 }
 0x2c9   : > { %v1144_v61 = vpop.f32.mrf.mxu2 }
 0x2ca   : > { %v1145_v62 = vadd.f32 %v1768_v32, %v1144_v61 }
 0x2cc   : > { %1228 = vst.msk [vmem:[%s1776_s19 + $0x1b0] sm:$0xff] %vm772_vm1, %v1145_v62 }
 0x2d1   : > { %v1147_v63 = vpop.f32.mrf.mxu2 }
 0x2d2   : > { %v1148_v0 = vadd.f32 %v1768_v32, %v1147_v63 }
 0x2d4   : > { %1229 = vst.msk [vmem:[%s1776_s19 + $0x1b8] sm:$0xff] %vm772_vm1, %v1148_v0 }
 0x2d9   : > { %v1150_v1 = vpop.f32.mrf.mxu2 }
 0x2da   : > { %v1151_v2 = vadd.f32 %v1768_v32, %v1150_v1 }
 0x2dc   : > { %1230 = vst.msk [vmem:[%s1776_s19 + $0x1c0] sm:$0xff] %vm772_vm1, %v1151_v2 }
 0x2e1   : > { %v1153_v3 = vpop.f32.mrf.mxu2 }
 0x2e2   : > { %v1154_v4 = vadd.f32 %v1768_v32, %v1153_v3 }
 0x2e4   : > { %1231 = vst.msk [vmem:[%s1776_s19 + $0x1c8] sm:$0xff] %vm772_vm1, %v1154_v4 }
 0x2e9   : > { %v1156_v5 = vpop.f32.mrf.mxu2 }
 0x2ea   : > { %v1157_v6 = vadd.f32 %v1768_v32, %v1156_v5 }
 0x2ec   : > { %1232 = vst.msk [vmem:[%s1776_s19 + $0x1d0] sm:$0xff] %vm772_vm1, %v1157_v6 }
 0x2f1   : > { %v1159_v7 = vpop.f32.mrf.mxu2 }
 0x2f2   : > { %v1160_v8 = vadd.f32 %v1768_v32, %v1159_v7 }
 0x2f4   : > { %1233 = vst.msk [vmem:[%s1776_s19 + $0x1d8] sm:$0xff] %vm772_vm1, %v1160_v8 }
 0x2f9   : > { %v1162_v9 = vpop.f32.mrf.mxu2 }
 0x2fa   : > { %v1163_v10 = vadd.f32 %v1768_v32, %v1162_v9 }
 0x2fc   : > { %1234 = vst.msk [vmem:[%s1776_s19 + $0x1e0] sm:$0xff] %vm772_vm1, %v1163_v10 }
 0x301   : > { %v1165_v11 = vpop.f32.mrf.mxu2 }
 0x302   : > { %v1166_v12 = vadd.f32 %v1768_v32, %v1165_v11 }
 0x304   : > { %1235 = vst.msk [vmem:[%s1776_s19 + $0x1e8] sm:$0xff] %vm772_vm1, %v1166_v12 }
 0x309   : > { %v1168_v13 = vpop.f32.mrf.mxu2 }
 0x30a   : > { %v1169_v14 = vadd.f32 %v1768_v32, %v1168_v13 }
 0x30c   : > { %1236 = vst.msk [vmem:[%s1776_s19 + $0x1f0] sm:$0xff] %vm772_vm1, %v1169_v14 }
 0x311   : > { %v1171_v15 = vpop.f32.mrf.mxu2 }
 0x312   : > { %v1172_v16 = vadd.f32 %v1768_v32, %v1171_v15 }
 0x314   : > { %1237 = vst.msk [vmem:[%s1776_s19 + $0x1f8] sm:$0xff] %vm772_vm1, %v1172_v16 }
 0x315 PF: > { %s15_s18 = sadd.s32 1, %s1584_s18  }
 0x316   : > { %p12_p4 = scmp.ge.s32.totalorder %s15_s18, 4  }
 0x318   :  { %14 = sbr.rel (!%p12_p4) target bundleno = 1 (0x1), region = 70 }

</bundles_post_ra>
